<compile_context>
chip_gen: v7x
topology: tpu7x:2x2x1
jax: 0.10.0
libtpu: 0.0.40
codegen_flags: <defaults>
</compile_context>

<pallas_src>
import jax
import jax.numpy as jnp
from jax.experimental import pallas as pl
from jax.experimental.pallas import tpu as pltpu

_LANE = 128


def _round_up(x, m):
    return ((x + m - 1) // m) * m


def q_mlp_kernel(xt_ref, w1t_ref, b1_ref, w2t_ref, b2_ref, w3_ref, out_ref):
    """One batch tile of the SAC critic MLP; batch is on the lane axis.

    xt_ref : (in_dim, TB)  streamed input tile (matmul dtype, e.g. bf16)
    w1t_ref: (Hp, in_dim)  resident transposed layer-1 weight
    b1_ref : (Hp, 1)       f32 bias column
    w2t_ref: (Hp, Hp)      resident transposed layer-2 weight
    b2_ref : (Hp, 1)       f32 bias column
    w3_ref : (Hp, 1)       f32 head weight column
    out_ref: (1, TB)       lane-dense f32 output row
    """
    # Layer 1 (MXU, f32 accumulate); elementwise math stays f32 (v5e-safe).
    h1 = jnp.dot(w1t_ref[...], xt_ref[...], preferred_element_type=jnp.float32)
    h1 = jnp.maximum(h1 + b1_ref[...], 0.0)

    # Layer 2: cast the intermediate to the resident weight dtype right before
    # the MXU (weights were pre-cast once in the wrapper; no per-step W2 cast).
    h2 = jnp.dot(w2t_ref[...], h1.astype(w2t_ref.dtype),
                 preferred_element_type=jnp.float32)
    h2 = jnp.maximum(h2 + b2_ref[...], 0.0)

    # Head (H -> 1): VPU broadcast-multiply + XLU sublane reduce. Keeps the MXU
    # free and directly yields a lane-dense (1, TB) row -> unmasked stores.
    out_ref[...] = jnp.sum(h2 * w3_ref[...], axis=0,
                           keepdims=True).astype(out_ref.dtype)


def _vmem_estimate(tb, in_dim, hp, mm_bytes):
    return (2 * in_dim * tb * mm_bytes      # streamed x^T (double buffered)
            + 2 * hp * in_dim * mm_bytes    # W1^T buffers
            + 2 * hp * hp * mm_bytes        # W2^T buffers
            + 6 * hp * _LANE * 4            # bias / head columns (lane-padded)
            + 3 * hp * tb * 4               # h1 / h2 / h1-cast intermediates
            + 2 * 8 * tb * 4)               # output row buffers (sublane-padded)


def q_forward(state, action, params, *, block_batch=2048,
              matmul_dtype=jnp.bfloat16, hidden_pad=256, min_grid=2):
    """state: (B, state_dim), action: (B, action_dim) -> (B, 1) float32."""
    w1, b1, w2, b2, w3, b3 = params
    B = state.shape[0]
    H = w1.shape[1]
    mm_dtype = jnp.dtype(matmul_dtype)
    mm_bytes = mm_dtype.itemsize

    # Pad the hidden dim to the native MXU tile (256 for v6e/v7x; also valid on
    # v5e). Zero padding is numerically exact (see correctness notes above).
    Hp = _round_up(H, hidden_pad)

    # --- Resident operands: transposed, padded and cast ONCE in the wrapper.
    w1t = jnp.zeros((Hp, w1.shape[0]), mm_dtype).at[:H].set(w1.T.astype(mm_dtype))
    w2t = jnp.zeros((Hp, Hp), mm_dtype).at[:H, :H].set(w2.T.astype(mm_dtype))
    b1c = jnp.zeros((Hp, 1), jnp.float32).at[:H, 0].set(b1.astype(jnp.float32))
    b2c = jnp.zeros((Hp, 1), jnp.float32).at[:H, 0].set(b2.astype(jnp.float32))
    w3c = jnp.zeros((Hp, 1), jnp.float32).at[:H].set(
        w3.reshape(H, 1).astype(jnp.float32))

    # --- Streamed input: concat + transpose (batch -> lanes) + cast fuse into
    # one XLA op, so the kernel DMAs half the bytes in the bf16 path.
    x_t = jnp.concatenate([state, action], axis=-1).T.astype(mm_dtype)
    in_dim = x_t.shape[0]

    # --- Batch tiling: batch is on lanes, so tiles are multiples of 128.
    block_batch = max(_LANE, _round_up(block_batch, _LANE))
    bp_min = _round_up(B, _LANE)
    if bp_min <= block_batch:
        # Split into >= min_grid steps when possible so both v7x TCs get work.
        TB = max(_LANE, _round_up(-(-bp_min // min_grid), _LANE))
    else:
        TB = block_batch
    # Shrink the tile if the f32 intermediates would blow the VMEM budget.
    while TB > _LANE and _vmem_estimate(TB, in_dim, Hp, mm_bytes) > (40 << 20):
        TB = max(_LANE, _round_up(TB // 2, _LANE))
    Bp = _round_up(B, TB)
    if Bp != B:
        x_t = jnp.pad(x_t, ((0, 0), (0, Bp - B)))

    vmem_limit = int(min(48 << 20,
                         max(32 << 20,
                             1.4 * _vmem_estimate(TB, in_dim, Hp, mm_bytes))))

    out = pl.pallas_call(
        q_mlp_kernel,
        out_shape=jax.ShapeDtypeStruct((1, Bp), jnp.float32),
        grid=(Bp // TB,),
        in_specs=[
            pl.BlockSpec((in_dim, TB), lambda i: (0, i)),  # x^T: streamed, pipelined
            pl.BlockSpec((Hp, in_dim), lambda i: (0, 0)),  # W1^T: resident
            pl.BlockSpec((Hp, 1),      lambda i: (0, 0)),  # b1 column
            pl.BlockSpec((Hp, Hp),     lambda i: (0, 0)),  # W2^T: resident
            pl.BlockSpec((Hp, 1),      lambda i: (0, 0)),  # b2 column
            pl.BlockSpec((Hp, 1),      lambda i: (0, 0)),  # w3 column
        ],
        out_specs=pl.BlockSpec((1, TB), lambda i: (0, i)),  # lane-dense row
        compiler_params=pltpu.CompilerParams(
            dimension_semantics=("parallel",),              # megacore on v7x
            vmem_limit_bytes=vmem_limit,
        ),
    )(x_t, w1t, b1c, w2t, b2c, w3c)

    # Final bias added wrapper-side (keeps a (1,1) block out of the kernel).
    return out[0, :B].reshape(B, 1) + b3.astype(jnp.float32).reshape(1, 1)


def init_params(key, state_dim, action_dim, hidden_dim):
    """Deterministic init mimicking torch.nn.Linear defaults (U[-1/sqrt(fan_in), +])."""
    def linear(k, fan_in, fan_out):
        kw, kb = jax.random.split(k)
        bound = 1.0 / jnp.sqrt(fan_in)
        w = jax.random.uniform(kw, (fan_in, fan_out), jnp.float32, -bound, bound)
        b = jax.random.uniform(kb, (fan_out,), jnp.float32, -bound, bound)
        return w, b

    k1, k2, k3 = jax.random.split(key, 3)
    w1, b1 = linear(k1, state_dim + action_dim, hidden_dim)
    w2, b2 = linear(k2, hidden_dim, hidden_dim)
    w3, b3 = linear(k3, hidden_dim, 1)
    return (w1, b1, w2, b2, w3, b3)


def q_reference(state, action, params):
    w1, b1, w2, b2, w3, b3 = params
    x = jnp.concatenate([state, action], axis=-1)
    h = jax.nn.relu(x @ w1 + b1)
    h = jax.nn.relu(h @ w2 + b2)
    return h @ w3 + b3


if __name__ == "__main__":
    B, state_dim, action_dim, hidden_dim = 8, 12, 4, 32

    key = jax.random.PRNGKey(0)
    k_s, k_a, k_p = jax.random.split(key, 3)
    state = jax.random.normal(k_s, (B, state_dim), jnp.float32)
    action = jax.random.normal(k_a, (B, action_dim), jnp.float32)
    params = init_params(k_p, state_dim, action_dim, hidden_dim)

    ref = q_reference(state, action, params)

    # f32-fed MXU path (tight check).
    out_f32 = jax.block_until_ready(
        q_forward(state, action, params, matmul_dtype=jnp.float32))
    assert out_f32.shape == (B, 1)
    assert jnp.allclose(out_f32, ref, atol=1e-3, rtol=1e-3), "f32 mismatch vs reference"

    # Default bf16-fed MXU path (f32 accumulate / f32 elementwise).
    out_bf16 = jax.block_until_ready(q_forward(state, action, params))
    assert out_bf16.shape == (B, 1)
    assert jnp.allclose(out_bf16, ref, atol=5e-2, rtol=5e-2), "bf16 mismatch vs reference"

    # Ragged batch exercising a multi-step batch grid + padding slice-off.
    B2 = 300
    s2 = jax.random.normal(jax.random.PRNGKey(1), (B2, state_dim), jnp.float32)
    a2 = jax.random.normal(jax.random.PRNGKey(2), (B2, action_dim), jnp.float32)
    out2 = jax.block_until_ready(
        q_forward(s2, a2, params, block_batch=256, matmul_dtype=jnp.float32))
    ref2 = q_reference(s2, a2, params)
    assert out2.shape == (B2, 1)
    assert jnp.allclose(out2, ref2, atol=1e-3, rtol=1e-3), "ragged-batch mismatch"

    print("KERNEL_OK")
</pallas_src>

<mosaic_0001>
module attributes {stable_mosaic.version = 11 : i64} {
  func.func @q_mlp_kernel(%arg0: i32, %arg1: memref<16x128xf32, #tpu.memory_space<vmem>>, %arg2: memref<256x16xf32, #tpu.memory_space<vmem>>, %arg3: memref<256x1xf32, #tpu.memory_space<vmem>>, %arg4: memref<256x256xf32, #tpu.memory_space<vmem>>, %arg5: memref<256x1xf32, #tpu.memory_space<vmem>>, %arg6: memref<256x1xf32, #tpu.memory_space<vmem>>, %arg7: memref<1x128xf32, #tpu.memory_space<vmem>>) attributes {dimension_semantics = [#tpu.dimension_semantics<parallel>], iteration_bounds = array<i64: 1>, scalar_prefetch = 0 : i64, scratch_operands = 0 : i64, tpu.core_type = #tpu.core_type<tc>, window_params = [{transform_indices = @transform_0, window_bounds = array<i64: 16, 128>}, {pipeline_mode = #tpu.pipeline_mode<synchronous>, transform_indices = @transform_1, window_bounds = array<i64: 256, 16>}, {pipeline_mode = #tpu.pipeline_mode<synchronous>, transform_indices = @transform_2, window_bounds = array<i64: 256, 1>}, {pipeline_mode = #tpu.pipeline_mode<synchronous>, transform_indices = @transform_3, window_bounds = array<i64: 256, 256>}, {pipeline_mode = #tpu.pipeline_mode<synchronous>, transform_indices = @transform_4, window_bounds = array<i64: 256, 1>}, {pipeline_mode = #tpu.pipeline_mode<synchronous>, transform_indices = @transform_5, window_bounds = array<i64: 256, 1>}, {transform_indices = @transform_6, window_bounds = array<i64: 1, 128>}]} {
    %c0 = arith.constant 0 : index
    %c0_0 = arith.constant 0 : index
    %0 = vector.load %arg2[%c0, %c0_0] : memref<256x16xf32, #tpu.memory_space<vmem>>, vector<256x16xf32>
    %c0_1 = arith.constant 0 : index
    %c0_2 = arith.constant 0 : index
    %1 = vector.load %arg1[%c0_1, %c0_2] : memref<16x128xf32, #tpu.memory_space<vmem>>, vector<16x128xf32>
    %cst = arith.constant dense<0.000000e+00> : vector<256x128xf32>
    %2 = tpu.matmul %0, %1, %cst {dimension_numbers = #tpu.dot_dimension_numbers<[1], [0], [0], [1], [0, 0, 1, 1], [], []>} : vector<256x16xf32>, vector<16x128xf32>, vector<256x128xf32> -> vector<256x128xf32>
    %c0_3 = arith.constant 0 : index
    %c0_4 = arith.constant 0 : index
    %3 = vector.load %arg3[%c0_3, %c0_4] : memref<256x1xf32, #tpu.memory_space<vmem>>, vector<256x1xf32>
    %4 = vector.broadcast %3 : vector<256x1xf32> to vector<256x128xf32>
    %5 = arith.addf %2, %4 : vector<256x128xf32>
    %cst_5 = arith.constant 0.000000e+00 : f32
    %6 = vector.broadcast %cst_5 : f32 to vector<256x128xf32>
    %7 = arith.maximumf %5, %6 : vector<256x128xf32>
    %c0_6 = arith.constant 0 : index
    %c0_7 = arith.constant 0 : index
    %8 = vector.load %arg4[%c0_6, %c0_7] : memref<256x256xf32, #tpu.memory_space<vmem>>, vector<256x256xf32>
    %cst_8 = arith.constant dense<0.000000e+00> : vector<256x128xf32>
    %9 = tpu.matmul %8, %7, %cst_8 {dimension_numbers = #tpu.dot_dimension_numbers<[1], [0], [0], [1], [0, 0, 1, 1], [], []>} : vector<256x256xf32>, vector<256x128xf32>, vector<256x128xf32> -> vector<256x128xf32>
    %c0_9 = arith.constant 0 : index
    %c0_10 = arith.constant 0 : index
    %10 = vector.load %arg5[%c0_9, %c0_10] : memref<256x1xf32, #tpu.memory_space<vmem>>, vector<256x1xf32>
    %11 = vector.broadcast %10 : vector<256x1xf32> to vector<256x128xf32>
    %12 = arith.addf %9, %11 : vector<256x128xf32>
    %cst_11 = arith.constant 0.000000e+00 : f32
    %13 = vector.broadcast %cst_11 : f32 to vector<256x128xf32>
    %14 = arith.maximumf %12, %13 : vector<256x128xf32>
    %c0_12 = arith.constant 0 : index
    %c0_13 = arith.constant 0 : index
    %15 = vector.load %arg6[%c0_12, %c0_13] : memref<256x1xf32, #tpu.memory_space<vmem>>, vector<256x1xf32>
    %16 = vector.broadcast %15 : vector<256x1xf32> to vector<256x128xf32>
    %17 = arith.mulf %14, %16 : vector<256x128xf32>
    %cst_14 = arith.constant dense<0.000000e+00> : vector<128xf32>
    %18 = vector.multi_reduction <add>, %17, %cst_14 [0] : vector<256x128xf32> to vector<128xf32>
    %19 = vector.shape_cast %18 : vector<128xf32> to vector<1x128xf32>
    %c0_15 = arith.constant 0 : index
    %c0_16 = arith.constant 0 : index
    %20 = vector.load %arg7[%c0_15, %c0_16] : memref<1x128xf32, #tpu.memory_space<vmem>>, vector<1x128xf32>
    tpu.vector_store %arg7[%c0_15, %c0_16], %19 {strides = array<i32>} : memref<1x128xf32, #tpu.memory_space<vmem>>, vector<1x128xf32>,
    return
  }
  func.func @transform_0(%arg0: i32) -> (i32, i32) {
    %c0_i32 = arith.constant 0 : i32
    %c0_i32_0 = arith.constant 0 : i32
    return %c0_i32, %arg0 : i32, i32
  }
  func.func @transform_1(%arg0: i32) -> (i32, i32) {
    %c0_i32 = arith.constant 0 : i32
    %c0_i32_0 = arith.constant 0 : i32
    %c0_i32_1 = arith.constant 0 : i32
    return %c0_i32, %c0_i32_0 : i32, i32
  }
  func.func @transform_2(%arg0: i32) -> (i32, i32) {
    %c0_i32 = arith.constant 0 : i32
    %c0_i32_0 = arith.constant 0 : i32
    %c0_i32_1 = arith.constant 0 : i32
    return %c0_i32, %c0_i32_0 : i32, i32
  }
  func.func @transform_3(%arg0: i32) -> (i32, i32) {
    %c0_i32 = arith.constant 0 : i32
    %c0_i32_0 = arith.constant 0 : i32
    %c0_i32_1 = arith.constant 0 : i32
    return %c0_i32, %c0_i32_0 : i32, i32
  }
  func.func @transform_4(%arg0: i32) -> (i32, i32) {
    %c0_i32 = arith.constant 0 : i32
    %c0_i32_0 = arith.constant 0 : i32
    %c0_i32_1 = arith.constant 0 : i32
    return %c0_i32, %c0_i32_0 : i32, i32
  }
  func.func @transform_5(%arg0: i32) -> (i32, i32) {
    %c0_i32 = arith.constant 0 : i32
    %c0_i32_0 = arith.constant 0 : i32
    %c0_i32_1 = arith.constant 0 : i32
    return %c0_i32, %c0_i32_0 : i32, i32
  }
  func.func @transform_6(%arg0: i32) -> (i32, i32) {
    %c0_i32 = arith.constant 0 : i32
    %c0_i32_0 = arith.constant 0 : i32
    return %c0_i32, %arg0 : i32, i32
  }
}

</mosaic_0001>

<bundles_post_ra>
// kernel: tpu_custom_call.1
= control target key start
LH: loop header
LB: loop body
LE: loop exit
PB: predicated region body
PF: predicated region fallthrough
CT: control target
= control target key end

     0   :  { %vm250_vm0 = vcmask 130048   ;;  %v1624_v3 = vmov 0   ;;  %s2479_s0 = inlined_call_operand.vmem [shape: f32[16,128], index: 0, kind: input, shape index: {}]   ;;  %s2480_s1 = inlined_call_operand.vmem [shape: f32[256,16], index: 1, kind: input, shape index: {}]   ;;  %s2481_s2 = inlined_call_operand.vmem [shape: f32[256,1], index: 2, kind: input, shape index: {}]   ;;  %s2482_s3 = inlined_call_operand.vmem [shape: f32[256,256], index: 3, kind: input, shape index: {}]   ;;  %s2483_s4 = inlined_call_operand.vmem [shape: f32[256,1], index: 4, kind: input, shape index: {}]   ;;  %s2484_s5 = inlined_call_operand.vmem [shape: f32[256,1], index: 5, kind: input, shape index: {}]   ;;  %s2485_s6 = inlined_call_operand.hbm [shape: f32[1,128], index: 6, kind: output, shape index: {}]  }
   0x1   :  { %v60_v0 = vld [vmem:[%s2481_s2 + $0x10] sm:$0xff]  ;;  %v58_v1 = vld [vmem:[%s2481_s2] sm:$0xff]  ;;  %1599 = vset.pattern.permute.xlu1 %v1624_v3  ;;  %1598 = vset.pattern.permute.xlu0 %v1624_v3  ;;  %v57_v4 = vld [vmem:[%s2479_s0 + $0x8] sm:$0xff] }
   0x2   :  { %v56_v2 = vld [vmem:[%s2479_s0] sm:$0xff]  ;;  %102 = vperm.xlu1 %1599, %v60_v0   ;;  %92 = vperm.xlu0 %1598, %v58_v1   ;;  %v61_v7 = vld [vmem:[%s2481_s2 + $0x18] sm:$0xff]  ;;  %v59_v8 = vld [vmem:[%s2481_s2 + $0x8] sm:$0xff] }
   0x3   :  { %v1511_v5 = vpack.c.bf16 %v57_v4, %v56_v2  ;;  %v24_v6 = vld [vmem:[%s2480_s1] sm:$0xff]  ;;  %v25_v9 = vld [vmem:[%s2480_s1 + $0x8] sm:$0xff]  ;;  %v26_v10 = vld [vmem:[%s2480_s1 + $0x10] sm:$0xff] }
   0x4   :  { %1463 = vmatprep.mubr.msk.f32.mxu0 %vm250_vm0, %v24_v6  ;;  %v63_v11 = vld [vmem:[%s2481_s2 + $0x28] sm:$0xff]  ;;  %v62_v12 = vld [vmem:[%s2481_s2 + $0x20] sm:$0xff]  ;;  %v27_v13 = vld [vmem:[%s2480_s1 + $0x18] sm:$0xff] }
   0x5   :  { %1512 = vmatprep.subr.bf16.mxu0 %v1511_v5  ;;  %v28_v14 = vld [vmem:[%s2480_s1 + $0x20] sm:$0xff]  ;;  %v65_v15 = vld [vmem:[%s2481_s2 + $0x38] sm:$0xff]  ;;  %v64_v16 = vld [vmem:[%s2481_s2 + $0x30] sm:$0xff] }
   0x6   :  { %1514 = vmatpush3.bf16.msra.mxu0 %v1511_v5  ;;  %107 = vperm.xlu1 %1599, %v61_v7   ;;  %v29_v17 = vld [vmem:[%s2480_s1 + $0x28] sm:$0xff]  ;;  %v30_v18 = vld [vmem:[%s2480_s1 + $0x30] sm:$0xff]  ;;  %v66_v20 = vld [vmem:[%s2481_s2 + $0x40] sm:$0xff] }
   0x7   :  { %97 = vperm.xlu0 %1598, %v59_v8   ;;  %v67_v19 = vld [vmem:[%s2481_s2 + $0x48] sm:$0xff]  ;;  %v31_v21 = vld [vmem:[%s2480_s1 + $0x38] sm:$0xff]  ;;  %v32_v22 = vld [vmem:[%s2480_s1 + $0x40] sm:$0xff] }
   0x8   :  { %v69_v23 = vld [vmem:[%s2481_s2 + $0x58] sm:$0xff]  ;;  %v68_v24 = vld [vmem:[%s2481_s2 + $0x50] sm:$0xff]  ;;  %v33_v25 = vld [vmem:[%s2480_s1 + $0x48] sm:$0xff] }
   0x9   :  { %1464 = vmatmul.mubr.msk.f32.vlgmr.msra.gmra.mrb[0].mxu0 %vm250_vm0, %v25_v9  ;;  %v34_v26 = vld [vmem:[%s2480_s1 + $0x50] sm:$0xff]  ;;  %v71_v27 = vld [vmem:[%s2481_s2 + $0x68] sm:$0xff]  ;;  %v70_v28 = vld [vmem:[%s2481_s2 + $0x60] sm:$0xff] }
   0xa   :  { %1466 = vmatprep.mubr.msk.f32.mxu0 %vm250_vm0, %v26_v10  ;;  %117 = vperm.xlu1 %1599, %v63_v11   ;;  %v35_v29 = vld [vmem:[%s2480_s1 + $0x58] sm:$0xff]  ;;  %v36_v30 = vld [vmem:[%s2480_s1 + $0x60] sm:$0xff]  ;;  %v72_v32 = vld [vmem:[%s2481_s2 + $0x70] sm:$0xff] }
   0xb   :  { %112 = vperm.xlu0 %1598, %v62_v12   ;;  %v73_v31 = vld [vmem:[%s2481_s2 + $0x78] sm:$0xff]  ;;  %v37_v33 = vld [vmem:[%s2480_s1 + $0x68] sm:$0xff]  ;;  %v38_v34 = vld [vmem:[%s2480_s1 + $0x70] sm:$0xff] }
   0xc   :  { %v75_v35 = vld [vmem:[%s2481_s2 + $0x88] sm:$0xff]  ;;  %v74_v36 = vld [vmem:[%s2481_s2 + $0x80] sm:$0xff]  ;;  %v39_v37 = vld [vmem:[%s2480_s1 + $0x78] sm:$0xff] }
   0xd   :  { %1467 = vmatmul.mubr.msk.f32.gmra.mrb[2].mxu0 %vm250_vm0, %v27_v13  ;;  %v40_v38 = vld [vmem:[%s2480_s1 + $0x80] sm:$0xff]  ;;  %v77_v39 = vld [vmem:[%s2481_s2 + $0x98] sm:$0xff]  ;;  %v76_v40 = vld [vmem:[%s2481_s2 + $0x90] sm:$0xff] }
   0xe   :  { %1469 = vmatprep.mubr.msk.f32.mxu0 %vm250_vm0, %v28_v14  ;;  %127 = vperm.xlu1 %1599, %v65_v15   ;;  %v41_v41 = vld [vmem:[%s2480_s1 + $0x88] sm:$0xff]  ;;  %v42_v42 = vld [vmem:[%s2480_s1 + $0x90] sm:$0xff]  ;;  %v78_v44 = vld [vmem:[%s2481_s2 + $0xa0] sm:$0xff] }
   0xf   :  { %122 = vperm.xlu0 %1598, %v64_v16   ;;  %v79_v43 = vld [vmem:[%s2481_s2 + $0xa8] sm:$0xff] }
  0x11   :  { %1470 = vmatmul.mubr.msk.f32.gmra.mrb[4].mxu0 %vm250_vm0, %v29_v17 }
  0x12   :  { %1472 = vmatprep.mubr.msk.f32.mxu0 %vm250_vm0, %v30_v18  ;;  %137 = vperm.xlu1 %1599, %v67_v19  }
  0x13   :  { %132 = vperm.xlu0 %1598, %v66_v20  }
  0x15   :  { %1473 = vmatmul.mubr.msk.f32.gmra.mrb[6].mxu0 %vm250_vm0, %v31_v21 }
  0x16   :  { %1475 = vmatprep.mubr.msk.f32.mxu0 %vm250_vm0, %v32_v22  ;;  %147 = vperm.xlu1 %1599, %v69_v23  }
  0x17   :  { %142 = vperm.xlu0 %1598, %v68_v24  }
  0x19   :  { %1476 = vmatmul.mubr.msk.f32.gmra.mrb[8].mxu0 %vm250_vm0, %v33_v25 }
  0x1a   :  { %1478 = vmatprep.mubr.msk.f32.mxu0 %vm250_vm0, %v34_v26  ;;  %157 = vperm.xlu1 %1599, %v71_v27  }
  0x1b   :  { %152 = vperm.xlu0 %1598, %v70_v28  }
  0x1d   :  { %1479 = vmatmul.mubr.msk.f32.gmra.mrb[10].mxu0 %vm250_vm0, %v35_v29 }
  0x1e   :  { %1481 = vmatprep.mubr.msk.f32.mxu0 %vm250_vm0, %v36_v30  ;;  %167 = vperm.xlu1 %1599, %v73_v31  }
  0x1f   :  { %162 = vperm.xlu0 %1598, %v72_v32  }
  0x21   :  { %1482 = vmatmul.mubr.msk.f32.gmra.mrb[12].mxu0 %vm250_vm0, %v37_v33 }
  0x22   :  { %1484 = vmatprep.mubr.msk.f32.mxu0 %vm250_vm0, %v38_v34  ;;  %177 = vperm.xlu1 %1599, %v75_v35  }
  0x23   :  { %172 = vperm.xlu0 %1598, %v74_v36  }
  0x25   :  { %1485 = vmatmul.mubr.msk.f32.gmra.mrb[14].mxu0 %vm250_vm0, %v39_v37 }
  0x26   :  { %1487 = vmatprep.mubr.msk.f32.mxu0 %vm250_vm0, %v40_v38  ;;  %187 = vperm.xlu1 %1599, %v77_v39  }
  0x27   :  { %182 = vperm.xlu0 %1598, %v76_v40  }
  0x28   :  { %11 = vsyncpa [#allocation3], 0  ;;  %v43_v45 = vld [vmem:[%s2480_s1 + $0x98] sm:$0xff]  ;;  %v44_v46 = vld [vmem:[%s2480_s1 + $0xa0] sm:$0xff]  ;;  %v1625_v24 = vmov 0.0|0.0  }
  0x29   :  { %1488 = vmatmul.mubr.msk.f32.gmra.mrb[16].mxu0 %vm250_vm0, %v41_v41  ;;  %v81_v47 = vld [vmem:[%s2481_s2 + $0xb8] sm:$0xff]  ;;  %v80_v48 = vld [vmem:[%s2481_s2 + $0xb0] sm:$0xff]  ;;  %v45_v49 = vld [vmem:[%s2480_s1 + $0xa8] sm:$0xff]  ;;  %1563 = vmatprep.subr.bf16.mxu1 %v1625_v24 }
  0x2a   :  { %1490 = vmatprep.mubr.msk.f32.mxu0 %vm250_vm0, %v42_v42  ;;  %197 = vperm.xlu1 %1599, %v79_v43   ;;  %v46_v50 = vld [vmem:[%s2480_s1 + $0xb0] sm:$0xff]  ;;  %v83_v51 = vld [vmem:[%s2481_s2 + $0xc8] sm:$0xff]  ;;  %v82_v52 = vld [vmem:[%s2481_s2 + $0xc0] sm:$0xff] }
  0x2b   :  { %192 = vperm.xlu0 %1598, %v78_v44   ;;  %v47_v53 = vld [vmem:[%s2480_s1 + $0xb8] sm:$0xff]  ;;  %v48_v54 = vld [vmem:[%s2480_s1 + $0xc0] sm:$0xff]  ;;  %v84_v56 = vld [vmem:[%s2481_s2 + $0xd0] sm:$0xff]  ;;  %1515 = vmatprep.subr.bf16.mxu0 %v1625_v24 }
  0x2c   :  { %v85_v55 = vld [vmem:[%s2481_s2 + $0xd8] sm:$0xff]  ;;  %v49_v57 = vld [vmem:[%s2480_s1 + $0xc8] sm:$0xff]  ;;  %v50_v58 = vld [vmem:[%s2480_s1 + $0xd0] sm:$0xff] }
  0x2d   :  { %1491 = vmatmul.mubr.msk.f32.gmra.mrb[18].mxu0 %vm250_vm0, %v43_v45  ;;  %v87_v59 = vld [vmem:[%s2481_s2 + $0xe8] sm:$0xff]  ;;  %v86_v60 = vld [vmem:[%s2481_s2 + $0xe0] sm:$0xff]  ;;  %v51_v61 = vld [vmem:[%s2480_s1 + $0xd8] sm:$0xff] }
  0x2e   :  { %1493 = vmatprep.mubr.msk.f32.mxu0 %vm250_vm0, %v44_v46  ;;  %207 = vperm.xlu1 %1599, %v81_v47   ;;  %v52_v62 = vld [vmem:[%s2480_s1 + $0xe0] sm:$0xff]  ;;  %v89_v63 = vld [vmem:[%s2481_s2 + $0xf8] sm:$0xff]  ;;  %v88_v0 = vld [vmem:[%s2481_s2 + $0xf0] sm:$0xff] }
  0x2f   :  { %202 = vperm.xlu0 %1598, %v80_v48   ;;  %v53_v1 = vld [vmem:[%s2480_s1 + $0xe8] sm:$0xff]  ;;  %v54_v2 = vld [vmem:[%s2480_s1 + $0xf0] sm:$0xff]  ;;  %v668_v4 = vld [vmem:[%s2483_s4] sm:$0xff] }
  0x30   :  { %v669_v3 = vld [vmem:[%s2483_s4 + $0x8] sm:$0xff]  ;;  %v55_v5 = vld [vmem:[%s2480_s1 + $0xf8] sm:$0xff]  ;;  %v670_v7 = vld [vmem:[%s2483_s4 + $0x10] sm:$0xff] }
  0x31   :  { %1494 = vmatmul.mubr.msk.f32.gmra.mrb[20].mxu0 %vm250_vm0, %v45_v49  ;;  %v671_v6 = vld [vmem:[%s2483_s4 + $0x18] sm:$0xff]  ;;  %v673_v8 = vld [vmem:[%s2483_s4 + $0x28] sm:$0xff]  ;;  %v672_v9 = vld [vmem:[%s2483_s4 + $0x20] sm:$0xff] }
  0x32   :  { %1496 = vmatprep.mubr.msk.f32.mxu0 %vm250_vm0, %v46_v50  ;;  %217 = vperm.xlu1 %1599, %v83_v51   ;;  %v675_v10 = vld [vmem:[%s2483_s4 + $0x38] sm:$0xff]  ;;  %v674_v11 = vld [vmem:[%s2483_s4 + $0x30] sm:$0xff]  ;;  %v677_v12 = vld [vmem:[%s2483_s4 + $0x48] sm:$0xff] }
  0x33   :  { %212 = vperm.xlu0 %1598, %v82_v52   ;;  %v676_v13 = vld [vmem:[%s2483_s4 + $0x40] sm:$0xff]  ;;  %v679_v14 = vld [vmem:[%s2483_s4 + $0x58] sm:$0xff]  ;;  %v678_v15 = vld [vmem:[%s2483_s4 + $0x50] sm:$0xff] }
  0x34   :  { %v681_v16 = vld [vmem:[%s2483_s4 + $0x68] sm:$0xff]  ;;  %v680_v17 = vld [vmem:[%s2483_s4 + $0x60] sm:$0xff]  ;;  %v683_v18 = vld [vmem:[%s2483_s4 + $0x78] sm:$0xff] }
  0x35   :  { %1497 = vmatmul.mubr.msk.f32.gmra.mrb[22].mxu0 %vm250_vm0, %v47_v53  ;;  %v682_v19 = vld [vmem:[%s2483_s4 + $0x70] sm:$0xff]  ;;  %v685_v20 = vld [vmem:[%s2483_s4 + $0x88] sm:$0xff]  ;;  %v684_v21 = vld [vmem:[%s2483_s4 + $0x80] sm:$0xff] }
  0x36   :  { %1499 = vmatprep.mubr.msk.f32.mxu0 %vm250_vm0, %v48_v54  ;;  %227 = vperm.xlu1 %1599, %v85_v55   ;;  %v687_v22 = vld [vmem:[%s2483_s4 + $0x98] sm:$0xff]  ;;  %v686_v23 = vld [vmem:[%s2483_s4 + $0x90] sm:$0xff]  ;;  %v689_v25 = vld [vmem:[%s2483_s4 + $0xa8] sm:$0xff] }
  0x37   :  { %222 = vperm.xlu0 %1598, %v84_v56   ;;  %v688_v26 = vld [vmem:[%s2483_s4 + $0xa0] sm:$0xff]  ;;  %v691_v27 = vld [vmem:[%s2483_s4 + $0xb8] sm:$0xff]  ;;  %v690_v28 = vld [vmem:[%s2483_s4 + $0xb0] sm:$0xff] }
  0x38   :  { %v693_v29 = vld [vmem:[%s2483_s4 + $0xc8] sm:$0xff]  ;;  %v692_v30 = vld [vmem:[%s2483_s4 + $0xc0] sm:$0xff]  ;;  %v695_v31 = vld [vmem:[%s2483_s4 + $0xd8] sm:$0xff] }
  0x39   :  { %1500 = vmatmul.mubr.msk.f32.gmra.mrb[24].mxu0 %vm250_vm0, %v49_v57  ;;  %v694_v32 = vld [vmem:[%s2483_s4 + $0xd0] sm:$0xff]  ;;  %v1117_v33 = vld [vmem:[%s2484_s5] sm:$0xff]  ;;  %v1118_v36 = vld [vmem:[%s2484_s5 + $0x8] sm:$0xff] }
  0x3a   :  { %1502 = vmatprep.mubr.msk.f32.mxu0 %vm250_vm0, %v50_v58  ;;  %237 = vperm.xlu1 %1599, %v87_v59   ;;  %v696_v34 = vld [vmem:[%s2483_s4 + $0xe0] sm:$0xff]  ;;  %v1119_v35 = vld [vmem:[%s2484_s5 + $0x10] sm:$0xff]  ;;  %v1120_v38 = vld [vmem:[%s2484_s5 + $0x18] sm:$0xff] }
  0x3b   :  { %232 = vperm.xlu0 %1598, %v86_v60   ;;  %v1121_v37 = vld [vmem:[%s2484_s5 + $0x20] sm:$0xff]  ;;  %v1123_v39 = vld [vmem:[%s2484_s5 + $0x30] sm:$0xff]  ;;  %v1122_v40 = vld [vmem:[%s2484_s5 + $0x28] sm:$0xff] }
  0x3c   :  { %v1125_v41 = vld [vmem:[%s2484_s5 + $0x40] sm:$0xff]  ;;  %v1124_v42 = vld [vmem:[%s2484_s5 + $0x38] sm:$0xff]  ;;  %v1127_v43 = vld [vmem:[%s2484_s5 + $0x50] sm:$0xff] }
  0x3d   :  { %1503 = vmatmul.mubr.msk.f32.gmra.mrb[26].mxu0 %vm250_vm0, %v51_v61  ;;  %v1126_v44 = vld [vmem:[%s2484_s5 + $0x48] sm:$0xff]  ;;  %v1129_v45 = vld [vmem:[%s2484_s5 + $0x60] sm:$0xff]  ;;  %v1128_v46 = vld [vmem:[%s2484_s5 + $0x58] sm:$0xff] }
  0x3e   :  { %1505 = vmatprep.mubr.msk.f32.mxu0 %vm250_vm0, %v52_v62  ;;  %247 = vperm.xlu1 %1599, %v89_v63   ;;  %v1131_v47 = vld [vmem:[%s2484_s5 + $0x70] sm:$0xff]  ;;  %v1130_v48 = vld [vmem:[%s2484_s5 + $0x68] sm:$0xff]  ;;  %v1133_v49 = vld [vmem:[%s2484_s5 + $0x80] sm:$0xff] }
  0x3f   :  { %242 = vperm.xlu0 %1598, %v88_v0   ;;  %v1132_v50 = vld [vmem:[%s2484_s5 + $0x78] sm:$0xff]  ;;  %v1135_v51 = vld [vmem:[%s2484_s5 + $0x90] sm:$0xff]  ;;  %v1134_v52 = vld [vmem:[%s2484_s5 + $0x88] sm:$0xff] }
  0x40   :  { %v1137_v53 = vld [vmem:[%s2484_s5 + $0xa0] sm:$0xff]  ;;  %v1136_v54 = vld [vmem:[%s2484_s5 + $0x98] sm:$0xff]  ;;  %v605_v55 = vld [vmem:[%s2482_s3 + $0x8] sm:$0xff] }
  0x41   :  { %1506 = vmatmul.mubr.msk.f32.gmra.mrb[28].mxu0 %vm250_vm0, %v53_v1  ;;  %v635_v56 = vld [vmem:[%s2482_s3 + $0xf8] sm:$0xff]  ;;  %v1139_v57 = vld [vmem:[%s2484_s5 + $0xb0] sm:$0xff]  ;;  %v1138_v58 = vld [vmem:[%s2484_s5 + $0xa8] sm:$0xff] }
  0x42   :  { %1508 = vmatprep.mubr.msk.f32.mxu0 %vm250_vm0, %v54_v2  ;;  %707 = vperm.xlu1 %1599, %v669_v3   ;;  %v1141_v59 = vld [vmem:[%s2484_s5 + $0xc0] sm:$0xff]  ;;  %v1140_v60 = vld [vmem:[%s2484_s5 + $0xb8] sm:$0xff]  ;;  %v1143_v61 = vld [vmem:[%s2484_s5 + $0xd0] sm:$0xff] }
  0x43   :  { %702 = vperm.xlu0 %1598, %v668_v4   ;;  %999 = vmatprep.mubr.f32.mxu1 %v635_v56  ;;  %v1142_v62 = vld [vmem:[%s2484_s5 + $0xc8] sm:$0xff]  ;;  %v1144_v63 = vld [vmem:[%s2484_s5 + $0xd8] sm:$0xff]  ;;  %v1145_v1 = vld [vmem:[%s2484_s5 + $0xe0] sm:$0xff] }
  0x44   :  { %v697_v0 = vld [vmem:[%s2483_s4 + $0xe8] sm:$0xff]  ;;  %v698_v2 = vld [vmem:[%s2483_s4 + $0xf0] sm:$0xff]  ;;  %v699_v4 = vld [vmem:[%s2483_s4 + $0xf8] sm:$0xff] }
  0x45   :  { %1509 = vmatmul.mubr.msk.f32.gmra.mrb[30].mxu0 %vm250_vm0, %v55_v5  ;;  %v1146_v3 = vld [vmem:[%s2484_s5 + $0xe8] sm:$0xff]  ;;  %v1148_v5 = vld [vmem:[%s2484_s5 + $0xf8] sm:$0xff] }
  0x46   :  { %717 = vperm.xlu1 %1599, %v671_v6   ;;  %924 = vmatprep.mubr.f32.mxu0 %v605_v55  ;;  %v1147_v6 = vld [vmem:[%s2484_s5 + $0xf0] sm:$0xff] }
  0x47   :  { %712 = vperm.xlu0 %1598, %v670_v7  }
  0x4a   :  { %727 = vperm.xlu1 %1599, %v673_v8  }
  0x4b   :  { %722 = vperm.xlu0 %1598, %v672_v9  }
  0x4e   :  { %737 = vperm.xlu1 %1599, %v675_v10  }
  0x4f   :  { %732 = vperm.xlu0 %1598, %v674_v11  }
  0x52   :  { %747 = vperm.xlu1 %1599, %v677_v12  }
  0x53   :  { %742 = vperm.xlu0 %1598, %v676_v13  }
  0x56   :  { %757 = vperm.xlu1 %1599, %v679_v14  }
  0x57   :  { %752 = vperm.xlu0 %1598, %v678_v15  }
  0x5a   :  { %767 = vperm.xlu1 %1599, %v681_v16  }
  0x5b   :  { %762 = vperm.xlu0 %1598, %v680_v17  }
  0x5e   :  { %777 = vperm.xlu1 %1599, %v683_v18  }
  0x5f   :  { %772 = vperm.xlu0 %1598, %v682_v19  }
  0x62   :  { %787 = vperm.xlu1 %1599, %v685_v20  }
  0x63   :  { %782 = vperm.xlu0 %1598, %v684_v21  }
  0x66   :  { %797 = vperm.xlu1 %1599, %v687_v22  }
  0x67   :  { %792 = vperm.xlu0 %1598, %v686_v23  }
  0x6a   :  { %807 = vperm.xlu1 %1599, %v689_v25  }
  0x6b   :  { %802 = vperm.xlu0 %1598, %v688_v26  }
  0x6e   :  { %817 = vperm.xlu1 %1599, %v691_v27  }
  0x6f   :  { %812 = vperm.xlu0 %1598, %v690_v28  }
  0x72   :  { %827 = vperm.xlu1 %1599, %v693_v29  }
  0x73   :  { %822 = vperm.xlu0 %1598, %v692_v30  }
  0x76   :  { %837 = vperm.xlu1 %1599, %v695_v31  }
  0x77   :  { %832 = vperm.xlu0 %1598, %v694_v32  }
  0x7a   :  { %1151 = vperm.xlu1 %1599, %v1117_v33  }
  0x7b   :  { %842 = vperm.xlu0 %1598, %v696_v34  }
  0x7e   :  { %1161 = vperm.xlu1 %1599, %v1119_v35  }
  0x7f   :  { %1156 = vperm.xlu0 %1598, %v1118_v36  }
  0x81   :  { %v103_v7 = vpop.permute.xlu1 %102  ;;  %v93_v8 = vpop.permute.xlu0 %92 }
  0x82   :  { %1171 = vperm.xlu1 %1599, %v1121_v37  }
  0x83   :  { %1166 = vperm.xlu0 %1598, %v1120_v38  }
  0x85   :  { %v108_v9 = vpop.permute.xlu1 %107 }
  0x86   :  { %1181 = vperm.xlu1 %1599, %v1123_v39   ;;  %v98_v10 = vpop.permute.xlu0 %97 }
  0x87   :  { %1176 = vperm.xlu0 %1598, %v1122_v40  }
  0x89   :  { %v118_v11 = vpop.permute.xlu1 %117 }
  0x8a   :  { %1191 = vperm.xlu1 %1599, %v1125_v41   ;;  %v113_v12 = vpop.permute.xlu0 %112 }
  0x8b   :  { %1186 = vperm.xlu0 %1598, %v1124_v42  }
  0x8d   :  { %v128_v13 = vpop.permute.xlu1 %127 }
  0x8e   :  { %1201 = vperm.xlu1 %1599, %v1127_v43   ;;  %v123_v14 = vpop.permute.xlu0 %122 }
  0x8f   :  { %1196 = vperm.xlu0 %1598, %v1126_v44  }
  0x91   :  { %v138_v15 = vpop.permute.xlu1 %137 }
  0x92   :  { %1211 = vperm.xlu1 %1599, %v1129_v45   ;;  %v133_v16 = vpop.permute.xlu0 %132 }
  0x93   :  { %1206 = vperm.xlu0 %1598, %v1128_v46  }
  0x95   :  { %v148_v17 = vpop.permute.xlu1 %147 }
  0x96   :  { %1221 = vperm.xlu1 %1599, %v1131_v47   ;;  %v143_v19 = vpop.permute.xlu0 %142 }
  0x97   :  { %1216 = vperm.xlu0 %1598, %v1130_v48  }
  0x99   :  { %v158_v29 = vpop.permute.xlu1 %157 }
  0x9a   :  { %1231 = vperm.xlu1 %1599, %v1133_v49   ;;  %v153_v32 = vpop.permute.xlu0 %152 }
  0x9b   :  { %1226 = vperm.xlu0 %1598, %v1132_v50  }
  0x9d   :  { %v168_v41 = vpop.permute.xlu1 %167 }
  0x9e   :  { %1241 = vperm.xlu1 %1599, %v1135_v51   ;;  %v163_v44 = vpop.permute.xlu0 %162 }
  0x9f   :  { %1236 = vperm.xlu0 %1598, %v1134_v52  }
  0xa2   :  { %1251 = vperm.xlu1 %1599, %v1137_v53  }
  0xa3   :  { %1246 = vperm.xlu0 %1598, %v1136_v54   ;;  %v178_v54 = vpop.permute.xlu1 %177 }
  0xa6   :  { %1261 = vperm.xlu1 %1599, %v1139_v57   ;;  %v173_v57 = vpop.permute.xlu0 %172 }
  0xa7   :  { %1256 = vperm.xlu0 %1598, %v1138_v58  }
  0xaa   :  { %1271 = vperm.xlu1 %1599, %v1141_v59  }
  0xab   :  { %1266 = vperm.xlu0 %1598, %v1140_v60  }
  0xae   :  { %1281 = vperm.xlu1 %1599, %v1143_v61  }
  0xaf   :  { %1276 = vperm.xlu0 %1598, %v1142_v62  }
  0xb2   :  { %1286 = vperm.xlu1 %1599, %v1144_v63  }
  0xb3   :  { %847 = vperm.xlu0 %1598, %v697_v0  }
  0xb6   :  { %1291 = vperm.xlu1 %1599, %v1145_v1  }
  0xb7   :  { %852 = vperm.xlu0 %1598, %v698_v2   ;;  %v188_v2 = vpop.permute.xlu1 %187 }
  0xba   :  { %1296 = vperm.xlu1 %1599, %v1146_v3  }
  0xbb   :  { %857 = vperm.xlu0 %1598, %v699_v4  }
  0xbe   :  { %1306 = vperm.xlu1 %1599, %v1148_v5   ;;  %v183_v5 = vpop.permute.xlu0 %182 }
  0xbf   :  { %1301 = vperm.xlu0 %1598, %v1147_v6  }
  0xdc   :  { %v1465_v18 = vpop.f32.mrb[0].mxu0 }
  0xdd   :  { %v419_v20 = vadd.f32 %v1465_v18, %v98_v10  ;;  %v413_v21 = vpop.f32.mrb[1].mxu0  ;;  %v193_v18 = vpop.permute.xlu0 %192 }
  0xde   :  { %v414_v22 = vadd.f32 %v413_v21, %v93_v8 }
  0xdf   :  { %v573_v23 = vmax.f32 %v419_v20, 0.0 }
  0xe0   :  { %v572_v25 = vmax.f32 %v414_v22, 0.0  ;;  %v1468_v26 = vpop.f32.mrb[2].mxu0 }
  0xe1   :  { %v429_v27 = vadd.f32 %v1468_v26, %v108_v9  ;;  %v423_v28 = vpop.f32.mrb[3].mxu0 }
  0xe2   :  { %v1516_v30 = vpack.c.bf16 %v573_v23, %v572_v25  ;;  %v424_v31 = vadd.f32 %v423_v28, %v103_v7 }
  0xe3   :  { %v575_v33 = vmax.f32 %v429_v27, 0.0 }
  0xe4   :  { %v574_v34 = vmax.f32 %v424_v31, 0.0  ;;  %v1471_v35 = vpop.f32.mrb[4].mxu0  ;;  %1517 = vmatpush1.bf16.msra.mxu0 %v1516_v30  ;;  %1579 = vmatpush1.bf16.msra.mxu1 %v1516_v30  ;;  %v203_v31 = vpop.permute.xlu0 %202 }
  0xe5   :  { %v439_v36 = vadd.f32 %v1471_v35, %v118_v11  ;;  %v433_v37 = vpop.f32.mrb[5].mxu0  ;;  %1518 = vmatprep.subr.bf16.mxu0 %v1625_v24  ;;  %1564 = vmatprep.subr.bf16.mxu1 %v1625_v24 }
  0xe6   :  { %v1519_v38 = vpack.c.bf16 %v575_v33, %v574_v34  ;;  %v434_v39 = vadd.f32 %v433_v37, %v113_v12 }
  0xe7   :  { %v577_v40 = vmax.f32 %v439_v36, 0.0 }
  0xe8   :  { %v576_v42 = vmax.f32 %v434_v39, 0.0  ;;  %v1474_v43 = vpop.f32.mrb[6].mxu0  ;;  %1520 = vmatpush1.bf16.msra.mxu0 %v1519_v38  ;;  %1580 = vmatpush1.bf16.msra.mxu1 %v1519_v38 }
  0xe9   :  { %v449_v45 = vadd.f32 %v1474_v43, %v128_v13  ;;  %v443_v46 = vpop.f32.mrb[7].mxu0  ;;  %1521 = vmatprep.subr.bf16.mxu0 %v1625_v24  ;;  %1565 = vmatprep.subr.bf16.mxu1 %v1625_v24 }
  0xea   :  { %v1522_v47 = vpack.c.bf16 %v577_v40, %v576_v42  ;;  %v444_v48 = vadd.f32 %v443_v46, %v123_v14 }
  0xeb   :  { %v579_v49 = vmax.f32 %v449_v45, 0.0 }
  0xec   :  { %v578_v50 = vmax.f32 %v444_v48, 0.0  ;;  %v1477_v51 = vpop.f32.mrb[8].mxu0  ;;  %1523 = vmatpush1.bf16.msra.mxu0 %v1522_v47  ;;  %1581 = vmatpush1.bf16.msra.mxu1 %v1522_v47 }
  0xed   :  { %v459_v52 = vadd.f32 %v1477_v51, %v138_v15  ;;  %v453_v53 = vpop.f32.mrb[9].mxu0  ;;  %1524 = vmatprep.subr.bf16.mxu0 %v1625_v24  ;;  %1566 = vmatprep.subr.bf16.mxu1 %v1625_v24  ;;  %v198_v15 = vpop.permute.xlu1 %197 }
  0xee   :  { %v1525_v55 = vpack.c.bf16 %v579_v49, %v578_v50  ;;  %v454_v56 = vadd.f32 %v453_v53, %v133_v16 }
  0xef   :  { %v581_v58 = vmax.f32 %v459_v52, 0.0 }
  0xf0   :  { %v580_v59 = vmax.f32 %v454_v56, 0.0  ;;  %v1480_v60 = vpop.f32.mrb[10].mxu0  ;;  %1526 = vmatpush1.bf16.msra.mxu0 %v1525_v55  ;;  %1582 = vmatpush1.bf16.msra.mxu1 %v1525_v55 }
  0xf1   :  { %v469_v61 = vadd.f32 %v1480_v60, %v148_v17  ;;  %v463_v62 = vpop.f32.mrb[11].mxu0  ;;  %1527 = vmatprep.subr.bf16.mxu0 %v1625_v24  ;;  %1567 = vmatprep.subr.bf16.mxu1 %v1625_v24  ;;  %v208_v28 = vpop.permute.xlu1 %207 }
  0xf2   :  { %v1528_v63 = vpack.c.bf16 %v581_v58, %v580_v59  ;;  %v464_v0 = vadd.f32 %v463_v62, %v143_v19 }
  0xf3   :  { %v583_v1 = vmax.f32 %v469_v61, 0.0 }
  0xf4   :  { %v582_v3 = vmax.f32 %v464_v0, 0.0  ;;  %v1483_v4 = vpop.f32.mrb[12].mxu0  ;;  %1529 = vmatpush1.bf16.msra.mxu0 %v1528_v63  ;;  %1583 = vmatpush1.bf16.msra.mxu1 %v1528_v63 }
  0xf5   :  { %v479_v6 = vadd.f32 %v1483_v4, %v158_v29  ;;  %v473_v7 = vpop.f32.mrb[13].mxu0  ;;  %1530 = vmatprep.subr.bf16.mxu0 %v1625_v24  ;;  %1568 = vmatprep.subr.bf16.mxu1 %v1625_v24 }
  0xf6   :  { %v1531_v8 = vpack.c.bf16 %v583_v1, %v582_v3  ;;  %v474_v9 = vadd.f32 %v473_v7, %v153_v32 }
  0xf7   :  { %v585_v10 = vmax.f32 %v479_v6, 0.0 }
  0xf8   :  { %v584_v11 = vmax.f32 %v474_v9, 0.0  ;;  %v1486_v12 = vpop.f32.mrb[14].mxu0  ;;  %1532 = vmatpush1.bf16.msra.mxu0 %v1531_v8  ;;  %1584 = vmatpush1.bf16.msra.mxu1 %v1531_v8 }
  0xf9   :  { %v489_v13 = vadd.f32 %v1486_v12, %v168_v41  ;;  %v483_v14 = vpop.f32.mrb[15].mxu0  ;;  %1533 = vmatprep.subr.bf16.mxu0 %v1625_v24  ;;  %1569 = vmatprep.subr.bf16.mxu1 %v1625_v24  ;;  %v218_v41 = vpop.permute.xlu1 %217 }
  0xfa   :  { %v1534_v16 = vpack.c.bf16 %v585_v10, %v584_v11  ;;  %v484_v17 = vadd.f32 %v483_v14, %v163_v44  ;;  %v213_v44 = vpop.permute.xlu0 %212 }
  0xfb   :  { %v587_v19 = vmax.f32 %v489_v13, 0.0 }
  0xfc   :  { %v586_v20 = vmax.f32 %v484_v17, 0.0  ;;  %v1489_v21 = vpop.f32.mrb[16].mxu0  ;;  %1535 = vmatpush1.bf16.msra.mxu0 %v1534_v16  ;;  %1585 = vmatpush1.bf16.msra.mxu1 %v1534_v16 }
  0xfd   :  { %v499_v22 = vadd.f32 %v1489_v21, %v178_v54  ;;  %v493_v23 = vpop.f32.mrb[17].mxu0  ;;  %1536 = vmatprep.subr.bf16.mxu0 %v1625_v24  ;;  %1570 = vmatprep.subr.bf16.mxu1 %v1625_v24  ;;  %v228_v53 = vpop.permute.xlu1 %227 }
  0xfe   :  { %v1537_v25 = vpack.c.bf16 %v587_v19, %v586_v20  ;;  %v494_v26 = vadd.f32 %v493_v23, %v173_v57  ;;  %v223_v56 = vpop.permute.xlu0 %222 }
  0xff   :  { %v589_v27 = vmax.f32 %v499_v22, 0.0 }
 0x100   :  { %v588_v29 = vmax.f32 %v494_v26, 0.0  ;;  %v1492_v30 = vpop.f32.mrb[18].mxu0  ;;  %1538 = vmatpush1.bf16.msra.mxu0 %v1537_v25  ;;  %1586 = vmatpush1.bf16.msra.mxu1 %v1537_v25  ;;  %v604_v26 = vld [vmem:[%s2482_s3] sm:$0xff] }
 0x101   :  { %v509_v32 = vadd.f32 %v1492_v30, %v188_v2  ;;  %v503_v33 = vpop.f32.mrb[19].mxu0  ;;  %1539 = vmatprep.subr.bf16.mxu0 %v1625_v24  ;;  %1571 = vmatprep.subr.bf16.mxu1 %v1625_v24  ;;  %v238_v2 = vpop.permute.xlu1 %237  ;;  %v636_v30 = vld [vmem:[%s2482_s3 + $0x100] sm:$0xff] }
 0x102   :  { %v1540_v34 = vpack.c.bf16 %v589_v27, %v588_v29  ;;  %v504_v35 = vadd.f32 %v503_v33, %v183_v5  ;;  %v233_v5 = vpop.permute.xlu0 %232  ;;  %v634_v27 = vld [vmem:[%s2482_s3 + $0xf0] sm:$0xff]  ;;  %v637_v29 = vld [vmem:[%s2482_s3 + $0x108] sm:$0xff]  ;;  %v608_v33 = vld [vmem:[%s2482_s3 + $0x20] sm:$0xff] }
 0x103   :  { %v591_v36 = vmax.f32 %v509_v32, 0.0  ;;  %v639_v32 = vld [vmem:[%s2482_s3 + $0x118] sm:$0xff] }
 0x104   :  { %v590_v37 = vmax.f32 %v504_v35, 0.0  ;;  %v1495_v38 = vpop.f32.mrb[20].mxu0  ;;  %1541 = vmatpush1.bf16.msra.mxu0 %v1540_v34  ;;  %1587 = vmatpush1.bf16.msra.mxu1 %v1540_v34  ;;  %v638_v34 = vld [vmem:[%s2482_s3 + $0x110] sm:$0xff]  ;;  %v611_v35 = vld [vmem:[%s2482_s3 + $0x38] sm:$0xff] }
 0x105   :  { %v519_v39 = vadd.f32 %v1495_v38, %v198_v15  ;;  %v513_v40 = vpop.f32.mrb[21].mxu0  ;;  %1542 = vmatprep.subr.bf16.mxu0 %v1625_v24  ;;  %1572 = vmatprep.subr.bf16.mxu1 %v1625_v24  ;;  %v248_v14 = vpop.permute.xlu1 %247  ;;  %v640_v38 = vld [vmem:[%s2482_s3 + $0x120] sm:$0xff] }
 0x106   :  { %v1543_v42 = vpack.c.bf16 %v591_v36, %v590_v37  ;;  %v514_v43 = vadd.f32 %v513_v40, %v193_v18  ;;  %v243_v17 = vpop.permute.xlu0 %242  ;;  %v641_v36 = vld [vmem:[%s2482_s3 + $0x128] sm:$0xff]  ;;  %v610_v37 = vld [vmem:[%s2482_s3 + $0x30] sm:$0xff]  ;;  %v643_v40 = vld [vmem:[%s2482_s3 + $0x138] sm:$0xff] }
 0x107   :  { %v593_v45 = vmax.f32 %v519_v39, 0.0  ;;  %v613_v39 = vld [vmem:[%s2482_s3 + $0x48] sm:$0xff] }
 0x108   :  { %v592_v46 = vmax.f32 %v514_v43, 0.0  ;;  %v1498_v47 = vpop.f32.mrb[22].mxu0  ;;  %1544 = vmatpush1.bf16.msra.mxu0 %v1543_v42  ;;  %1588 = vmatpush1.bf16.msra.mxu1 %v1543_v42  ;;  %v642_v42 = vld [vmem:[%s2482_s3 + $0x130] sm:$0xff]  ;;  %v615_v43 = vld [vmem:[%s2482_s3 + $0x58] sm:$0xff] }
 0x109   :  { %v529_v48 = vadd.f32 %v1498_v47, %v208_v28  ;;  %v523_v49 = vpop.f32.mrb[23].mxu0  ;;  %1545 = vmatprep.subr.bf16.mxu0 %v1625_v24  ;;  %1573 = vmatprep.subr.bf16.mxu1 %v1625_v24  ;;  %v607_v28 = vld [vmem:[%s2482_s3 + $0x18] sm:$0xff]  ;;  %v617_v47 = vld [vmem:[%s2482_s3 + $0x68] sm:$0xff] }
 0x10a   :  { %v1546_v50 = vpack.c.bf16 %v593_v45, %v592_v46  ;;  %v524_v51 = vadd.f32 %v523_v49, %v203_v31  ;;  %v609_v31 = vld [vmem:[%s2482_s3 + $0x28] sm:$0xff]  ;;  %v614_v45 = vld [vmem:[%s2482_s3 + $0x50] sm:$0xff]  ;;  %v644_v46 = vld [vmem:[%s2482_s3 + $0x140] sm:$0xff] }
 0x10b   :  { %v595_v52 = vmax.f32 %v529_v48, 0.0  ;;  %v647_v48 = vld [vmem:[%s2482_s3 + $0x158] sm:$0xff]  ;;  %v616_v49 = vld [vmem:[%s2482_s3 + $0x60] sm:$0xff] }
 0x10c   :  { %v594_v54 = vmax.f32 %v524_v51, 0.0  ;;  %v1501_v55 = vpop.f32.mrb[24].mxu0  ;;  %1547 = vmatpush1.bf16.msra.mxu0 %v1546_v50  ;;  %1589 = vmatpush1.bf16.msra.mxu1 %v1546_v50  ;;  %v646_v50 = vld [vmem:[%s2482_s3 + $0x150] sm:$0xff]  ;;  %v619_v51 = vld [vmem:[%s2482_s3 + $0x78] sm:$0xff] }
 0x10d   :  { %v539_v57 = vadd.f32 %v1501_v55, %v218_v41  ;;  %v533_v58 = vpop.f32.mrb[25].mxu0  ;;  %1548 = vmatprep.subr.bf16.mxu0 %v1625_v24  ;;  %1574 = vmatprep.subr.bf16.mxu1 %v1625_v24  ;;  %v612_v41 = vld [vmem:[%s2482_s3 + $0x40] sm:$0xff]  ;;  %v621_v55 = vld [vmem:[%s2482_s3 + $0x88] sm:$0xff] }
 0x10e   :  { %v1549_v59 = vpack.c.bf16 %v595_v52, %v594_v54  ;;  %v534_v60 = vadd.f32 %v533_v58, %v213_v44  ;;  %v645_v44 = vld [vmem:[%s2482_s3 + $0x148] sm:$0xff]  ;;  %v648_v54 = vld [vmem:[%s2482_s3 + $0x160] sm:$0xff]  ;;  %v650_v58 = vld [vmem:[%s2482_s3 + $0x170] sm:$0xff] }
 0x10f   :  { %v597_v61 = vmax.f32 %v539_v57, 0.0  ;;  %v649_v52 = vld [vmem:[%s2482_s3 + $0x168] sm:$0xff]  ;;  %v620_v57 = vld [vmem:[%s2482_s3 + $0x80] sm:$0xff] }
 0x110   :  { %v596_v62 = vmax.f32 %v534_v60, 0.0  ;;  %v1504_v63 = vpop.f32.mrb[26].mxu0  ;;  %1550 = vmatpush1.bf16.msra.mxu0 %v1549_v59  ;;  %1590 = vmatpush1.bf16.msra.mxu1 %v1549_v59  ;;  %v623_v59 = vld [vmem:[%s2482_s3 + $0x98] sm:$0xff]  ;;  %v653_v60 = vld [vmem:[%s2482_s3 + $0x188] sm:$0xff] }
 0x111   :  { %v549_v0 = vadd.f32 %v1504_v63, %v228_v53  ;;  %v543_v1 = vpop.f32.mrb[27].mxu0  ;;  %1551 = vmatprep.subr.bf16.mxu0 %v1625_v24  ;;  %1575 = vmatprep.subr.bf16.mxu1 %v1625_v24  ;;  %v618_v53 = vld [vmem:[%s2482_s3 + $0x70] sm:$0xff]  ;;  %v625_v63 = vld [vmem:[%s2482_s3 + $0xa8] sm:$0xff] }
 0x112   :  { %v1552_v3 = vpack.c.bf16 %v597_v61, %v596_v62  ;;  %v544_v4 = vadd.f32 %v543_v1, %v223_v56  ;;  %v651_v56 = vld [vmem:[%s2482_s3 + $0x178] sm:$0xff]  ;;  %v622_v61 = vld [vmem:[%s2482_s3 + $0x90] sm:$0xff]  ;;  %v652_v62 = vld [vmem:[%s2482_s3 + $0x180] sm:$0xff] }
 0x113   :  { %v599_v6 = vmax.f32 %v549_v0, 0.0  ;;  %v655_v0 = vld [vmem:[%s2482_s3 + $0x198] sm:$0xff]  ;;  %v624_v1 = vld [vmem:[%s2482_s3 + $0xa0] sm:$0xff] }
 0x114   :  { %v598_v7 = vmax.f32 %v544_v4, 0.0  ;;  %v1507_v8 = vpop.f32.mrb[28].mxu0  ;;  %1553 = vmatpush1.bf16.msra.mxu0 %v1552_v3  ;;  %1591 = vmatpush1.bf16.msra.mxu1 %v1552_v3  ;;  %v627_v3 = vld [vmem:[%s2482_s3 + $0xb8] sm:$0xff]  ;;  %v657_v4 = vld [vmem:[%s2482_s3 + $0x1a8] sm:$0xff] }
 0x115   :  { %v559_v9 = vadd.f32 %v1507_v8, %v238_v2  ;;  %v553_v10 = vpop.f32.mrb[29].mxu0  ;;  %1554 = vmatprep.subr.bf16.mxu0 %v1625_v24  ;;  %1576 = vmatprep.subr.bf16.mxu1 %v1625_v24  ;;  %v654_v2 = vld [vmem:[%s2482_s3 + $0x190] sm:$0xff]  ;;  %v659_v8 = vld [vmem:[%s2482_s3 + $0x1b8] sm:$0xff] }
 0x116   :  { %v1555_v11 = vpack.c.bf16 %v599_v6, %v598_v7  ;;  %v554_v12 = vadd.f32 %v553_v10, %v233_v5  ;;  %v626_v5 = vld [vmem:[%s2482_s3 + $0xb0] sm:$0xff]  ;;  %v656_v6 = vld [vmem:[%s2482_s3 + $0x1a0] sm:$0xff]  ;;  %v629_v7 = vld [vmem:[%s2482_s3 + $0xc8] sm:$0xff] }
 0x117   :  { %v601_v13 = vmax.f32 %v559_v9, 0.0  ;;  %v628_v9 = vld [vmem:[%s2482_s3 + $0xc0] sm:$0xff]  ;;  %v658_v10 = vld [vmem:[%s2482_s3 + $0x1b0] sm:$0xff] }
 0x118   :  { %v600_v15 = vmax.f32 %v554_v12, 0.0  ;;  %v1510_v16 = vpop.f32.mrb[30].mxu0  ;;  %1556 = vmatpush1.bf16.msra.mxu0 %v1555_v11  ;;  %1592 = vmatpush1.bf16.msra.mxu1 %v1555_v11  ;;  %v631_v11 = vld [vmem:[%s2482_s3 + $0xd8] sm:$0xff]  ;;  %v661_v12 = vld [vmem:[%s2482_s3 + $0x1c8] sm:$0xff] }
 0x119   :  { %v569_v18 = vadd.f32 %v1510_v16, %v248_v14  ;;  %v563_v19 = vpop.f32.mrb[31].mxu0  ;;  %1557 = vmatprep.subr.bf16.mxu0 %v1625_v24  ;;  %1577 = vmatprep.subr.bf16.mxu1 %v1625_v24  ;;  %v660_v14 = vld [vmem:[%s2482_s3 + $0x1c0] sm:$0xff]  ;;  %v663_v16 = vld [vmem:[%s2482_s3 + $0x1d8] sm:$0xff] }
 0x11a   :  { %v1558_v20 = vpack.c.bf16 %v601_v13, %v600_v15  ;;  %v564_v21 = vadd.f32 %v563_v19, %v243_v17  ;;  %v630_v13 = vld [vmem:[%s2482_s3 + $0xd0] sm:$0xff]  ;;  %v633_v15 = vld [vmem:[%s2482_s3 + $0xe8] sm:$0xff]  ;;  %v632_v17 = vld [vmem:[%s2482_s3 + $0xe0] sm:$0xff] }
 0x11b   :  { %v603_v22 = vmax.f32 %v569_v18, 0.0  ;;  %v662_v18 = vld [vmem:[%s2482_s3 + $0x1d0] sm:$0xff]  ;;  %v665_v19 = vld [vmem:[%s2482_s3 + $0x1e8] sm:$0xff] }
 0x11c   :  { %v602_v23 = vmax.f32 %v564_v21, 0.0  ;;  %1559 = vmatpush1.bf16.msra.mxu0 %v1558_v20  ;;  %1593 = vmatpush1.bf16.msra.mxu1 %v1558_v20  ;;  %v664_v20 = vld [vmem:[%s2482_s3 + $0x1e0] sm:$0xff]  ;;  %v667_v21 = vld [vmem:[%s2482_s3 + $0x1f8] sm:$0xff] }
 0x11d   :  { %1560 = vmatprep.subr.bf16.mxu0 %v1625_v24  ;;  %1578 = vmatprep.subr.bf16.mxu1 %v1625_v24  ;;  %v606_v24 = vld [vmem:[%s2482_s3 + $0x10] sm:$0xff] }
 0x11e   :  { %v1561_v25 = vpack.c.bf16 %v603_v22, %v602_v23  ;;  %v666_v22 = vld [vmem:[%s2482_s3 + $0x1f0] sm:$0xff]  ;;  %v703_v23 = vpop.permute.xlu0 %702  ;;  %s1626_s3 = smov [#allocation2]  }
 0x11f   :  { %s1385_s30 = sshll.u32 %s1626_s3, 4  ;;  %s1386_s30 = int_to_ptr.vmem [resolvable:$true] %s1385_s30 }
 0x120   :  { %1562 = vmatpush1.bf16.msra.mxu0 %v1561_v25  ;;  %1594 = vmatpush1.bf16.msra.mxu1 %v1561_v25  ;;  %v708_v25 = vpop.permute.xlu1 %707  ;;  %s1600_s7 = scalar_lea.vmem %s1386_s30, 16  ;;  %s1604_s8 = scalar_lea.vmem %s1386_s30, 32 }
 0x121   :  { %p1601_p0 = scmp.ne.s32.totalorder %s1386_s30, %s1600_s7  ;;  %p1605_p1 = scmp.lt.s32.totalorder %s1386_s30, %s1386_s30 }
 0x122   :  { %p1606_p2 = scmp.lt.s32.totalorder %s1604_s8, %s1600_s7 }
 0x123   :  { %925 = vmatmul.mubr.f32.vlgmr.msra.gmra.mrb[32].mxu0 %v604_v26  ;;  %1000 = vmatmul.mubr.f32.vlgmr.msra.gmra.mrb[0].mxu1 %v634_v27  ;;  %v713_v26 = vpop.permute.xlu0 %712 }
 0x124   :  { %929 = vmatprep.mubr.f32.mxu0 %v607_v28  ;;  %1004 = vmatprep.mubr.f32.mxu1 %v637_v29  ;;  %v718_v27 = vpop.permute.xlu1 %717  ;;  %p1607_p3 = por %p1606_p2, %p1605_p1 }
 0x126   :  { %p1608_p4 = pnand %p1607_p3, %p1601_p0 }
 0x127   :  { %930 = vmatmul.mubr.f32.gmra.mrb[34].mxu0 %v606_v24  ;;  %1005 = vmatmul.mubr.f32.gmra.mrb[2].mxu1 %v636_v30  ;;  %v2308_v28 = vpop.permute.xlu0 %722 }
 0x128   :  { %934 = vmatprep.mubr.f32.mxu0 %v609_v31  ;;  %1009 = vmatprep.mubr.f32.mxu1 %v639_v32  ;;  %v2310_v29 = vpop.permute.xlu1 %727 }
 0x12b   :  { %935 = vmatmul.mubr.f32.gmra.mrb[36].mxu0 %v608_v33  ;;  %1010 = vmatmul.mubr.f32.gmra.mrb[4].mxu1 %v638_v34  ;;  %v2312_v24 = vpop.permute.xlu0 %732 }
 0x12c   :  { %939 = vmatprep.mubr.f32.mxu0 %v611_v35  ;;  %1014 = vmatprep.mubr.f32.mxu1 %v641_v36  ;;  %v2314_v30 = vpop.permute.xlu1 %737 }
 0x12f   :  { %940 = vmatmul.mubr.f32.gmra.mrb[38].mxu0 %v610_v37  ;;  %1015 = vmatmul.mubr.f32.gmra.mrb[6].mxu1 %v640_v38  ;;  %v2316_v31 = vpop.permute.xlu0 %742 }
 0x130   :  { %944 = vmatprep.mubr.f32.mxu0 %v613_v39  ;;  %1019 = vmatprep.mubr.f32.mxu1 %v643_v40  ;;  %v2318_v32 = vpop.permute.xlu1 %747 }
 0x133   :  { %945 = vmatmul.mubr.f32.gmra.mrb[40].mxu0 %v612_v41  ;;  %1020 = vmatmul.mubr.f32.gmra.mrb[8].mxu1 %v642_v42  ;;  %v2320_v33 = vpop.permute.xlu0 %752 }
 0x134   :  { %949 = vmatprep.mubr.f32.mxu0 %v615_v43  ;;  %1024 = vmatprep.mubr.f32.mxu1 %v645_v44  ;;  %v2322_v34 = vpop.permute.xlu1 %757 }
 0x137   :  { %950 = vmatmul.mubr.f32.gmra.mrb[42].mxu0 %v614_v45  ;;  %1025 = vmatmul.mubr.f32.gmra.mrb[10].mxu1 %v644_v46  ;;  %v2324_v35 = vpop.permute.xlu0 %762 }
 0x138   :  { %954 = vmatprep.mubr.f32.mxu0 %v617_v47  ;;  %1029 = vmatprep.mubr.f32.mxu1 %v647_v48  ;;  %v2326_v36 = vpop.permute.xlu1 %767 }
 0x13b   :  { %955 = vmatmul.mubr.f32.gmra.mrb[44].mxu0 %v616_v49  ;;  %1030 = vmatmul.mubr.f32.gmra.mrb[12].mxu1 %v646_v50  ;;  %v2328_v37 = vpop.permute.xlu0 %772 }
 0x13c   :  { %959 = vmatprep.mubr.f32.mxu0 %v619_v51  ;;  %1034 = vmatprep.mubr.f32.mxu1 %v649_v52  ;;  %v2330_v38 = vpop.permute.xlu1 %777 }
 0x13f   :  { %960 = vmatmul.mubr.f32.gmra.mrb[46].mxu0 %v618_v53  ;;  %1035 = vmatmul.mubr.f32.gmra.mrb[14].mxu1 %v648_v54  ;;  %v2332_v39 = vpop.permute.xlu0 %782 }
 0x140   :  { %964 = vmatprep.mubr.f32.mxu0 %v621_v55  ;;  %1039 = vmatprep.mubr.f32.mxu1 %v651_v56  ;;  %v2334_v40 = vpop.permute.xlu1 %787 }
 0x143   :  { %965 = vmatmul.mubr.f32.gmra.mrb[48].mxu0 %v620_v57  ;;  %1040 = vmatmul.mubr.f32.gmra.mrb[16].mxu1 %v650_v58  ;;  %v2336_v41 = vpop.permute.xlu0 %792 }
 0x144   :  { %969 = vmatprep.mubr.f32.mxu0 %v623_v59  ;;  %1044 = vmatprep.mubr.f32.mxu1 %v653_v60  ;;  %v2338_v42 = vpop.permute.xlu1 %797 }
 0x147   :  { %970 = vmatmul.mubr.f32.gmra.mrb[50].mxu0 %v622_v61  ;;  %1045 = vmatmul.mubr.f32.gmra.mrb[18].mxu1 %v652_v62  ;;  %v2340_v43 = vpop.permute.xlu0 %802 }
 0x148   :  { %974 = vmatprep.mubr.f32.mxu0 %v625_v63  ;;  %1049 = vmatprep.mubr.f32.mxu1 %v655_v0  ;;  %v2342_v44 = vpop.permute.xlu1 %807 }
 0x14b   :  { %975 = vmatmul.mubr.f32.gmra.mrb[52].mxu0 %v624_v1  ;;  %1050 = vmatmul.mubr.f32.gmra.mrb[20].mxu1 %v654_v2  ;;  %v2344_v45 = vpop.permute.xlu0 %812 }
 0x14c   :  { %979 = vmatprep.mubr.f32.mxu0 %v627_v3  ;;  %1054 = vmatprep.mubr.f32.mxu1 %v657_v4  ;;  %v2346_v46 = vpop.permute.xlu1 %817 }
 0x14f   :  { %980 = vmatmul.mubr.f32.gmra.mrb[54].mxu0 %v626_v5  ;;  %1055 = vmatmul.mubr.f32.gmra.mrb[22].mxu1 %v656_v6  ;;  %v2348_v47 = vpop.permute.xlu0 %822 }
 0x150   :  { %984 = vmatprep.mubr.f32.mxu0 %v629_v7  ;;  %1059 = vmatprep.mubr.f32.mxu1 %v659_v8  ;;  %v2350_v48 = vpop.permute.xlu1 %827 }
 0x153   :  { %985 = vmatmul.mubr.f32.gmra.mrb[56].mxu0 %v628_v9  ;;  %1060 = vmatmul.mubr.f32.gmra.mrb[24].mxu1 %v658_v10  ;;  %v2352_v49 = vpop.permute.xlu0 %832 }
 0x154   :  { %989 = vmatprep.mubr.f32.mxu0 %v631_v11  ;;  %1064 = vmatprep.mubr.f32.mxu1 %v661_v12  ;;  %v2354_v50 = vpop.permute.xlu1 %837 }
 0x157   :  { %990 = vmatmul.mubr.f32.gmra.mrb[58].mxu0 %v630_v13  ;;  %1065 = vmatmul.mubr.f32.gmra.mrb[26].mxu1 %v660_v14  ;;  %v2356_v51 = vpop.permute.xlu0 %842 }
 0x158   :  { %994 = vmatprep.mubr.f32.mxu0 %v633_v15  ;;  %1069 = vmatprep.mubr.f32.mxu1 %v663_v16  ;;  %v1152_v52 = vpop.permute.xlu1 %1151 }
 0x15b   :  { %995 = vmatmul.mubr.f32.gmra.mrb[60].mxu0 %v632_v17  ;;  %1070 = vmatmul.mubr.f32.gmra.mrb[28].mxu1 %v662_v18  ;;  %v1157_v53 = vpop.permute.xlu0 %1156 }
 0x15c   :  { %1074 = vmatprep.mubr.f32.mxu1 %v665_v19  ;;  %v1162_v54 = vpop.permute.xlu1 %1161 }
 0x15f   :  { %1075 = vmatmul.mubr.f32.gmra.mrb[30].mxu1 %v664_v20  ;;  %v1167_v55 = vpop.permute.xlu0 %1166 }
 0x160   :  { %1079 = vmatprep.mubr.f32.mxu1 %v667_v21  ;;  %v1172_v56 = vpop.permute.xlu1 %1171 }
 0x163   :  { %1080 = vmatmul.mubr.f32.gmra.mrb[32].mxu1 %v666_v22  ;;  %v1177_v57 = vpop.permute.xlu0 %1176 }
 0x164   :  { %v2358_v58 = vpop.permute.xlu1 %1181 }
 0x167   :  { %v2360_v59 = vpop.permute.xlu0 %1186 }
 0x168   :  { %v2364_v1 = vpop.permute.xlu1 %1191 }
 0x16b   :  { %v2368_v8 = vpop.permute.xlu0 %1196 }
 0x16c   :  { %v2372_v17 = vpop.permute.xlu1 %1201 }
 0x1f6   :  { %v926_v60 = vpop.f32.mrb[32].mxu0  ;;  %v2362_v61 = vpop.f32.mrb[0].mxu1 }
 0x1f7   :  { %v927_v62 = vadd.f32 %v926_v60, %v703_v23  ;;  %v928_v63 = vpop.f32.mrb[33].mxu0  ;;  %v1003_v0 = vpop.f32.mrb[1].mxu1 }
 0x1f9   :  { %v1085_v4 = vmax.f32 %v927_v62, 0.0  ;;  %v2376_v62 = vpop.permute.xlu0 %1206 }
 0x1fa   :  { %v931_v2 = vpop.f32.mrb[34].mxu0  ;;  %v2366_v3 = vpop.f32.mrb[2].mxu1 }
 0x1fb   :  { %v932_v5 = vadd.f32 %v931_v2, %v708_v25  ;;  %v933_v6 = vpop.f32.mrb[35].mxu0  ;;  %v1008_v7 = vpop.f32.mrb[3].mxu1  ;;  %v1309_v12 = vmul.f32 %v1152_v52, %v1085_v4 }
 0x1fc   :  { %v2381_v6 = vpop.permute.xlu1 %1211 }
 0x1fd   :  { %v1086_v9 = vmax.f32 %v932_v5, 0.0 }
 0x1fe   :  { %v936_v10 = vpop.f32.mrb[36].mxu0  ;;  %v2370_v11 = vpop.f32.mrb[4].mxu1 }
 0x1ff   :  { %v1310_v13 = vmul.f32 %v1157_v53, %v1086_v9  ;;  %v937_v14 = vadd.f32 %v936_v10, %v713_v26  ;;  %v938_v15 = vpop.f32.mrb[37].mxu0  ;;  %v1013_v16 = vpop.f32.mrb[5].mxu1 }
 0x200   :  { %v2386_v15 = vpop.permute.xlu0 %1216 }
 0x201   :  { %v1341_v18 = vadd.f32 %v1310_v13, %v1309_v12  ;;  %v1087_v19 = vmax.f32 %v937_v14, 0.0 }
 0x202   :  { %v941_v20 = vpop.f32.mrb[38].mxu0  ;;  %v2374_v21 = vpop.f32.mrb[6].mxu1 }
 0x203   :  { %v1311_v22 = vmul.f32 %v1162_v54, %v1087_v19  ;;  %v942_v23 = vadd.f32 %v941_v20, %v718_v27  ;;  %v943_v25 = vpop.f32.mrb[39].mxu0  ;;  %v1018_v60 = vpop.f32.mrb[7].mxu1 }
 0x204   :  { %v2391_v25 = vpop.permute.xlu1 %1221 }
 0x205   :  { %v1342_v63 = vadd.f32 %v1341_v18, %v1311_v22  ;;  %v1088_v0 = vmax.f32 %v942_v23, 0.0 }
 0x206   :  { %v946_v52 = vpop.f32.mrb[40].mxu0  ;;  %v2378_v53 = vpop.f32.mrb[8].mxu1 }
 0x207   :  { %v1312_v26 = vmul.f32 %v1167_v55, %v1088_v0  ;;  %v947_v2 = vadd.f32 %v946_v52, %v2308_v28  ;;  %v948_v4 = vpop.f32.mrb[41].mxu0  ;;  %v1023_v5 = vpop.f32.mrb[9].mxu1 }
 0x208   :  { %v2397_v4 = vpop.permute.xlu0 %1226 }
 0x209   :  { %v1343_v7 = vadd.f32 %v1342_v63, %v1312_v26  ;;  %v1089_v9 = vmax.f32 %v947_v2, 0.0 }
 0x20a   :  { %v951_v54 = vpop.f32.mrb[42].mxu0  ;;  %v2383_v27 = vpop.f32.mrb[10].mxu1 }
 0x20b   :  { %v1313_v10 = vmul.f32 %v1172_v56, %v1089_v9  ;;  %v952_v12 = vadd.f32 %v951_v54, %v2310_v29  ;;  %v953_v13 = vpop.f32.mrb[43].mxu0  ;;  %v1028_v14 = vpop.f32.mrb[11].mxu1 }
 0x20c   :  { %v2403_v13 = vpop.permute.xlu1 %1231 }
 0x20d   :  { %v1344_v16 = vadd.f32 %v1343_v7, %v1313_v10  ;;  %v1090_v55 = vmax.f32 %v952_v12, 0.0 }
 0x20e   :  { %v956_v18 = vpop.f32.mrb[44].mxu0  ;;  %v2388_v28 = vpop.f32.mrb[12].mxu1 }
 0x20f   :  { %v1314_v19 = vmul.f32 %v1177_v57, %v1090_v55  ;;  %v957_v20 = vadd.f32 %v956_v18, %v2312_v24  ;;  %v958_v22 = vpop.f32.mrb[45].mxu0  ;;  %v1033_v23 = vpop.f32.mrb[13].mxu1 }
 0x210   :  { %v2409_v22 = vpop.permute.xlu0 %1236 }
 0x211   :  { %v1345_v60 = vadd.f32 %v1344_v16, %v1314_v19  ;;  %v1091_v56 = vmax.f32 %v957_v20, 0.0 }
 0x212   :  { %v961_v63 = vpop.f32.mrb[46].mxu0  ;;  %v2393_v29 = vpop.f32.mrb[14].mxu1 }
 0x213   :  { %v1315_v0 = vmul.f32 %v2358_v58, %v1091_v56  ;;  %v962_v52 = vadd.f32 %v961_v63, %v2314_v30  ;;  %v963_v26 = vpop.f32.mrb[47].mxu0  ;;  %v1038_v2 = vpop.f32.mrb[15].mxu1 }
 0x214   :  { %v2415_v26 = vpop.permute.xlu1 %1241 }
 0x215   :  { %v1346_v57 = vadd.f32 %v1345_v60, %v1315_v0  ;;  %v1092_v5 = vmax.f32 %v962_v52, 0.0 }
 0x216   :  { %v966_v24 = vpop.f32.mrb[48].mxu0  ;;  %v2399_v7 = vpop.f32.mrb[16].mxu1 }
 0x217   :  { %v1316_v9 = vmul.f32 %v2360_v59, %v1092_v5  ;;  %v967_v54 = vadd.f32 %v966_v24, %v2316_v31  ;;  %v968_v10 = vpop.f32.mrb[49].mxu0  ;;  %v1043_v12 = vpop.f32.mrb[17].mxu1 }
 0x218   :  { %v1247_v10 = vpop.permute.xlu0 %1246 }
 0x219   :  { %v1347_v58 = vadd.f32 %v1346_v57, %v1316_v9  ;;  %v1093_v14 = vmax.f32 %v967_v54, 0.0 }
 0x21a   :  { %v971_v30 = vpop.f32.mrb[50].mxu0  ;;  %v2405_v16 = vpop.f32.mrb[18].mxu1 }
 0x21b   :  { %v1317_v55 = vmul.f32 %v2364_v1, %v1093_v14  ;;  %v972_v18 = vadd.f32 %v971_v30, %v2318_v32  ;;  %v973_v19 = vpop.f32.mrb[51].mxu0  ;;  %v1048_v20 = vpop.f32.mrb[19].mxu1 }
 0x21c   :  { %v1252_v19 = vpop.permute.xlu1 %1251 }
 0x21d   :  { %v1348_v59 = vadd.f32 %v1347_v58, %v1317_v55  ;;  %v1094_v23 = vmax.f32 %v972_v18, 0.0 }
 0x21e   :  { %v976_v31 = vpop.f32.mrb[52].mxu0  ;;  %v2411_v60 = vpop.f32.mrb[20].mxu1 }
 0x21f   :  { %v1318_v56 = vmul.f32 %v2368_v8, %v1094_v23  ;;  %v977_v63 = vadd.f32 %v976_v31, %v2320_v33  ;;  %v978_v0 = vpop.f32.mrb[53].mxu0  ;;  %v1053_v52 = vpop.f32.mrb[21].mxu1 }
 0x220   :  { %v1257_v0 = vpop.permute.xlu0 %1256 }
 0x221   :  { %v1349_v1 = vadd.f32 %v1348_v59, %v1318_v56  ;;  %v1095_v2 = vmax.f32 %v977_v63, 0.0 }
 0x222   :  { %v981_v32 = vpop.f32.mrb[54].mxu0  ;;  %v2417_v57 = vpop.f32.mrb[22].mxu1 }
 0x223   :  { %v1319_v5 = vmul.f32 %v2372_v17, %v1095_v2  ;;  %v982_v24 = vadd.f32 %v981_v32, %v2322_v34  ;;  %v983_v9 = vpop.f32.mrb[55].mxu0  ;;  %v1058_v54 = vpop.f32.mrb[23].mxu1  ;;  %v1007_v32 = vadd.f32 %v2366_v3, %v2332_v39 }
 0x224   :  { %v1262_v9 = vpop.permute.xlu1 %1261 }
 0x225   :  { %v1350_v12 = vadd.f32 %v1349_v1, %v1319_v5  ;;  %v1096_v8 = vmax.f32 %v982_v24, 0.0 }
 0x226   :  { %v986_v58 = vpop.f32.mrb[56].mxu0  ;;  %v2421_v33 = vpop.f32.mrb[24].mxu1 }
 0x227   :  { %v1320_v14 = vmul.f32 %v2376_v62, %v1096_v8  ;;  %v987_v30 = vadd.f32 %v986_v58, %v2324_v35  ;;  %v988_v55 = vpop.f32.mrb[57].mxu0  ;;  %v1063_v18 = vpop.f32.mrb[25].mxu1  ;;  %v1002_v62 = vadd.f32 %v2362_v61, %v2330_v38  ;;  %v1101_v58 = vmax.f32 %v1007_v32, 0.0 }
 0x228   :  { %v1022_v55 = vadd.f32 %v2378_v53, %v2338_v42 }
 0x229   :  { %v1351_v20 = vadd.f32 %v1350_v12, %v1320_v14  ;;  %v1097_v59 = vmax.f32 %v987_v30, 0.0  ;;  %v1100_v54 = vmax.f32 %v1002_v62, 0.0  ;;  %v1012_v12 = vadd.f32 %v2370_v11, %v2334_v40 }
 0x22a   :  { %v991_v17 = vpop.f32.mrb[58].mxu0  ;;  %v2425_v23 = vpop.f32.mrb[26].mxu1  ;;  %v1017_v14 = vadd.f32 %v2374_v21, %v2336_v41  ;;  %v1325_v11 = vmul.f32 %v2403_v13, %v1101_v58  ;;  %v1037_v13 = vadd.f32 %v2393_v29, %v2344_v45  ;;  %v1052_v45 = vadd.f32 %v2411_v60, %v2350_v48 }
 0x22b   :  { %v1321_v34 = vmul.f32 %v2381_v6, %v1097_v59  ;;  %v992_v31 = vadd.f32 %v991_v17, %v2326_v36  ;;  %v993_v56 = vpop.f32.mrb[59].mxu0  ;;  %v1068_v63 = vpop.f32.mrb[27].mxu1  ;;  %v1102_v30 = vmax.f32 %v1012_v12, 0.0  ;;  %v1027_v17 = vadd.f32 %v2383_v27, %v2340_v43 }
 0x22c   :  { %v1103_v59 = vmax.f32 %v1017_v14, 0.0  ;;  %v1042_v27 = vadd.f32 %v2399_v7, %v2346_v46  ;;  %v1057_v46 = vadd.f32 %v2417_v57, %v2352_v49  ;;  %v1067_v48 = vadd.f32 %v2425_v23, %v2356_v51 }
 0x22d   :  { %v1352_v52 = vadd.f32 %v1351_v20, %v1321_v34  ;;  %v1098_v35 = vmax.f32 %v992_v31, 0.0  ;;  %v1272_v20 = vpop.permute.xlu1 %1271  ;;  %v1104_v34 = vmax.f32 %v1022_v55, 0.0  ;;  %v1105_v53 = vmax.f32 %v1027_v17, 0.0 }
 0x22e   :  { %v996_v1 = vpop.f32.mrb[60].mxu0  ;;  %v2431_v2 = vpop.f32.mrb[28].mxu1  ;;  %v1327_v42 = vmul.f32 %v2415_v26, %v1103_v59  ;;  %v1111_v12 = vmax.f32 %v1057_v46, 0.0  ;;  %v1113_v14 = vmax.f32 %v1067_v48, 0.0 }
 0x22f   :  { %v1322_v5 = vmul.f32 %v2386_v15, %v1098_v35  ;;  %v997_v6 = vadd.f32 %v996_v1, %v2328_v37  ;;  %v998_v24 = vpop.f32.mrb[61].mxu0  ;;  %v1073_v36 = vpop.f32.mrb[29].mxu1  ;;  %v1324_v37 = vmul.f32 %v2397_v4, %v1100_v54  ;;  %v1032_v4 = vadd.f32 %v2388_v28, %v2342_v44 }
 0x230   :  { %v1267_v15 = vpop.permute.xlu0 %1266  ;;  %v1329_v35 = vmul.f32 %v1252_v19, %v1105_v53  ;;  %v1107_v1 = vmax.f32 %v1037_v13, 0.0  ;;  %v1047_v44 = vadd.f32 %v2405_v16, %v2348_v47  ;;  %v1110_v36 = vmax.f32 %v1052_v45, 0.0 }
 0x231   :  { %v1353_v38 = vadd.f32 %v1352_v52, %v1322_v5  ;;  %v1099_v61 = vmax.f32 %v997_v6, 0.0  ;;  %v1282_v62 = vpop.permute.xlu1 %1281  ;;  %v1328_v52 = vmul.f32 %v1247_v10, %v1104_v34  ;;  %v1106_v43 = vmax.f32 %v1032_v4, 0.0 }
 0x232   :  { %v1076_v8 = vpop.f32.mrb[30].mxu1  ;;  %v1108_v5 = vmax.f32 %v1042_v27, 0.0  ;;  %v1331_v10 = vmul.f32 %v1262_v9, %v1107_v1  ;;  %v1109_v24 = vmax.f32 %v1047_v44, 0.0  ;;  %v1062_v47 = vadd.f32 %v2421_v33, %v2354_v50 }
 0x233   :  { %v1323_v39 = vmul.f32 %v2391_v25, %v1099_v61  ;;  %v1078_v3 = vpop.f32.mrb[31].mxu1  ;;  %v1326_v25 = vmul.f32 %v2409_v22, %v1102_v30  ;;  %v1330_v26 = vmul.f32 %v1257_v0, %v1106_v43  ;;  %v1335_v57 = vmul.f32 %v1282_v62, %v1111_v12 }
 0x234   :  { %v1277_v56 = vpop.permute.xlu0 %1276  ;;  %v1332_v19 = vmul.f32 %v1267_v15, %v1108_v5  ;;  %v1333_v0 = vmul.f32 %v1272_v20, %v1109_v24  ;;  %v1112_v61 = vmax.f32 %v1062_v47, 0.0 }
 0x235   :  { %v1354_v18 = vadd.f32 %v1353_v38, %v1323_v39  ;;  %v1287_v6 = vpop.permute.xlu1 %1286  ;;  %v1334_v9 = vmul.f32 %v1277_v56, %v1110_v36 }
 0x236   :  { %v1081_v40 = vpop.f32.mrb[32].mxu1  ;;  %v1336_v50 = vmul.f32 %v1287_v6, %v1112_v61 }
 0x237   :  { %v1355_v41 = vadd.f32 %v1354_v18, %v1324_v37  ;;  %v1083_v21 = vpop.f32.mrb[33].mxu1 }
 0x238   :  { %v848_v32 = vpop.permute.xlu0 %847 }
 0x239   :  { %v1356_v31 = vadd.f32 %v1355_v41, %v1325_v11  ;;  %v1292_v38 = vpop.permute.xlu1 %1291  ;;  %v1072_v58 = vadd.f32 %v2431_v2, %v848_v32 }
 0x23a   :  { %v1337_v18 = vmul.f32 %v1292_v38, %v1113_v14 }
 0x23b   :  { %v1357_v63 = vadd.f32 %v1356_v31, %v1326_v25  ;;  %v1114_v33 = vmax.f32 %v1072_v58, 0.0 }
 0x23c   :  { %v853_v54 = vpop.permute.xlu0 %852 }
 0x23d   :  { %v1358_v22 = vadd.f32 %v1357_v63, %v1327_v42  ;;  %v1077_v3 = vadd.f32 %v1076_v8, %v853_v54  ;;  %v1297_v55 = vpop.permute.xlu1 %1296 }
 0x23e   :  { %v1338_v23 = vmul.f32 %v1297_v55, %v1114_v33 }
 0x23f   :  { %v1359_v28 = vadd.f32 %v1358_v22, %v1328_v52  ;;  %v1115_v51 = vmax.f32 %v1077_v3, 0.0 }
 0x240   :  { %v858_v15 = vpop.permute.xlu0 %857 }
 0x241   :  { %v1360_v29 = vadd.f32 %v1359_v28, %v1329_v35  ;;  %v1082_v30 = vadd.f32 %v1081_v40, %v858_v15  ;;  %v1307_v21 = vpop.permute.xlu1 %1306 }
 0x243   :  { %v1361_v7 = vadd.f32 %v1360_v29, %v1330_v26  ;;  %v1116_v59 = vmax.f32 %v1082_v30, 0.0 }
 0x244   :  { %v1302_v17 = vpop.permute.xlu0 %1301 }
 0x245   :  { %v1362_v16 = vadd.f32 %v1361_v7, %v1331_v10  ;;  %v1339_v2 = vmul.f32 %v1302_v17, %v1115_v51  ;;  %v1340_v34 = vmul.f32 %v1307_v21, %v1116_v59 }
 0x247   :  { %v1363_v60 = vadd.f32 %v1362_v16, %v1332_v19 }
 0x249   :  { %v1364_v49 = vadd.f32 %v1363_v60, %v1333_v0 }
 0x24b   :  { %v1365_v39 = vadd.f32 %v1364_v49, %v1334_v9 }
 0x24d   :  { %v1366_v37 = vadd.f32 %v1365_v39, %v1335_v57 }
 0x24f   :  { %v1367_v20 = vadd.f32 %v1366_v37, %v1336_v50 }
 0x251   :  { %v1368_v11 = vadd.f32 %v1367_v20, %v1337_v18 }
 0x253   :  { %v1369_v41 = vadd.f32 %v1368_v11, %v1338_v23 }
 0x255   :  { %v1370_v25 = vadd.f32 %v1369_v41, %v1339_v2 }
 0x257   :  { %v1371_v4 = vadd.f32 %v1370_v25, %v1340_v34 }
 0x259   :  { %v1372_v8 = vrot.slane %v1371_v4, 4 }
 0x25b   :  { %v1373_v31 = vadd.f32 %v1372_v8, %v1371_v4 }
 0x25d   :  { %v1374_v56 = vrot.slane %v1373_v31, 2 }
 0x25f   :  { %v1375_v42 = vadd.f32 %v1374_v56, %v1373_v31 }
 0x261   :  { %v1376_v40 = vrot.slane %v1375_v42, 1 }
 0x263   :  { %v1377_v53 = vadd.f32 %v1376_v40, %v1375_v42 }
 0x265   :  { %1378 = vst [vmem:[#allocation2] sm:$0x1] %v1377_v53 }
 0x266   :  { %1611 = shalt.err (!%p1608_p4)
}
 0x267   :  { %s1612_s0 = scalar_lea.hbm %s2485_s6, 16 }
 0x268   :  { %p1613_p5 = scmp.ne.s32.totalorder %s2485_s6, %s1612_s0  ;;  %p1616_p6 = scmp.lt.u32.totalorder %s1612_s0, %s2485_s6 }
 0x26a   :  { %p1618_p7 = pnand %p1616_p6, %p1613_p5 }
 0x26c   :  { %1621 = shalt.err (!%p1618_p7)
}
 0x26d   :  { %1388 = dma.vmem_to_hbm [thread:$0]  %s1386_s30, 16, %s2485_s6, [#allocation3]  }
 0x26e   :  { %1622 = dma.done.wait [#allocation3], 16  }
 0x26f   :  { %1623 = vsyncadd [#allocation3], 4294967280 }
 0x270   :  { %1392 = vsyncpa [#allocation3], 1 }

</bundles_post_ra>
